<compile_context>
chip_gen: v7x
topology: tpu7x:2x2x1
jax: 0.10.0
libtpu: 0.0.40
codegen_flags: <defaults>
</compile_context>

<pallas_src>
import math

import jax
import jax.numpy as jnp
from jax.experimental import pallas as pl
from jax.experimental.pallas import tpu as pltpu


def _diag_mul_kernel(d_ref, x_ref, o_ref):
    # x_ref: (block_rows, tile_n); d_ref: (1, tile_n) -> broadcast over rows.
    o_ref[...] = x_ref[...] * d_ref[...]


def diagonal_forward(x, diagonal, *,
                     target_tile_bytes=2 * 1024 * 1024,
                     max_tile_n=2048,
                     min_pallas_bytes=1 << 20,
                     force_pallas=False):
    """Elementwise multiply by a diagonal vector along the last axis.

    x:        (batch, *, size) array
    diagonal: (size,)          array
    """
    orig_shape = x.shape
    size = orig_shape[-1]
    assert diagonal.shape == (size,)

    # Complex path: complex_mul is just the complex elementwise product, which
    # XLA fuses fine; keep exact module semantics via the fallback.
    # TODO(synk): dedicated Pallas complex path (split real/imag planes).
    if jnp.iscomplexobj(x) or jnp.iscomplexobj(diagonal):
        return x * diagonal

    diagonal = diagonal.astype(x.dtype)
    itemsize = jnp.dtype(x.dtype).itemsize
    total_bytes = x.size * itemsize

    # Tiny inputs: kernel launch + pipeline priming costs more than a fused
    # XLA broadcast multiply.
    if not force_pallas and total_bytes < min_pallas_bytes:
        return x * diagonal

    rows = x.size // size
    x2d = x.reshape(rows, size)
    d = diagonal

    # Sublane packing: 8 rows for 32-bit dtypes, 16 for 16-bit, 32 for 8-bit.
    sublane = max(8, 32 // itemsize)

    # ---- Lane-dense folding for narrow features (size < 128) --------------
    # Fold `folded_k` consecutive rows into the lane axis so the last dim is a
    # multiple of 128 (unmasked vector stores).  Only when it is a pure
    # reshape — never pay an extra HBM copy for padding.
    folded_k = 1
    if size < 128:
        k = 128 // math.gcd(size, 128)
        if rows % k == 0:
            folded_k = k
    if folded_k > 1:
        rows_f = rows // folded_k
        lane_w = folded_k * size
        x2d = x2d.reshape(rows_f, lane_w)
        d = jnp.tile(d, folded_k)
    else:
        rows_f = rows
        lane_w = size

    # ---- Lane-axis tiling for wide features --------------------------------
    if lane_w <= max_tile_n:
        tile_n = lane_w                 # full-extent lane block (always legal)
    elif lane_w % 128 == 0:
        tile_n = 128                    # largest 128-multiple divisor <= cap
        for cand in range(max_tile_n, 127, -128):
            if lane_w % cand == 0:
                tile_n = cand
                break
    else:
        # Ragged lane boundary: block stays 128-aligned; Pallas masks the
        # out-of-bounds tail of the last lane block.
        tile_n = max_tile_n
    n_lane_blocks = pl.cdiv(lane_w, tile_n)

    # ---- Row tiling: ~target_tile_bytes per input tile, sublane-aligned ----
    # No host padding: the last (ragged) row block is masked by Pallas.
    br = max(sublane,
             (target_tile_bytes // (tile_n * itemsize)) // sublane * sublane)
    br = min(br, pl.cdiv(rows_f, sublane) * sublane)
    n_row_blocks = pl.cdiv(rows_f, br)
    # Even out per-block work (keeps block count, shrinks last-block skew).
    br = pl.cdiv(pl.cdiv(rows_f, n_row_blocks), sublane) * sublane
    n_row_blocks = pl.cdiv(rows_f, br)

    d2d = d.reshape(1, lane_w)

    cost = pl.CostEstimate(
        flops=rows * size,
        transcendentals=0,
        bytes_accessed=2 * rows * size * itemsize + size * itemsize,
    )

    out = pl.pallas_call(
        _diag_mul_kernel,
        out_shape=jax.ShapeDtypeStruct((rows_f, lane_w), x.dtype),
        grid_spec=pltpu.PrefetchScalarGridSpec(
            num_scalar_prefetch=0,
            # Lane axis outermost: the (tiny) diagonal block index is constant
            # across the inner row sweep, so Pallas skips re-copying it.
            grid=(n_lane_blocks, n_row_blocks),
            in_specs=[
                # diagonal tile: follows the lane grid axis only.
                pl.BlockSpec((1, tile_n), lambda l, r: (0, l)),
                # input tile.
                pl.BlockSpec((br, tile_n), lambda l, r: (r, l)),
            ],
            out_specs=pl.BlockSpec((br, tile_n), lambda l, r: (r, l)),
        ),
        compiler_params=pltpu.CompilerParams(
            dimension_semantics=("parallel", "parallel"),
        ),
        cost_estimate=cost,
    )(d2d, x2d)

    # Undo lane folding (pure reshape, no copy of consequence).
    if folded_k > 1:
        out = out.reshape(rows, size)
    return out.reshape(orig_shape)


if __name__ == "__main__":
    key = jax.random.PRNGKey(0)
    keys = jax.random.split(key, 16)

    # Case 1: module-scale shape (batch=2, seq=8, size=32) -> lane-folded path
    # (rows=16 divisible by fold factor 4).
    batch, seq, size = 2, 8, 32
    x = jax.random.normal(keys[0], (batch, seq, size), dtype=jnp.float32)
    diag = jax.random.normal(keys[1], (size,), dtype=jnp.float32)
    out = diagonal_forward(x, diag, force_pallas=True)
    jax.block_until_ready(out)
    ref = x * diag
    assert out.shape == x.shape
    assert jnp.allclose(out, ref, atol=1e-6, rtol=1e-6)

    # Default call (small input) exercises the XLA fallback path.
    out_fb = diagonal_forward(x, diag)
    jax.block_until_ready(out_fb)
    assert jnp.allclose(out_fb, ref, atol=1e-6, rtol=1e-6)

    # Case 2: wide feature dim -> lane-axis tiling (tile_n=2048, 2 lane blocks).
    x2 = jax.random.normal(keys[2], (2, 16, 4096), dtype=jnp.float32)
    d2 = jax.random.normal(keys[3], (4096,), dtype=jnp.float32)
    out2 = diagonal_forward(x2, d2, force_pallas=True)
    jax.block_until_ready(out2)
    assert jnp.allclose(out2, x2 * d2, atol=1e-6, rtol=1e-6)

    # Case 3: row count not divisible by fold factor -> no-fold narrow path,
    # ragged row block (no host padding).
    x3 = jax.random.normal(keys[4], (3, 5, 32), dtype=jnp.float32)
    d3 = jax.random.normal(keys[5], (32,), dtype=jnp.float32)
    out3 = diagonal_forward(x3, d3, force_pallas=True)
    jax.block_until_ready(out3)
    assert jnp.allclose(out3, x3 * d3, atol=1e-6, rtol=1e-6)

    # Case 4: size >= 128 but not a multiple of 128 -> full-extent lane block.
    x4 = jax.random.normal(keys[6], (2, 10, 160), dtype=jnp.float32)
    d4 = jax.random.normal(keys[7], (160,), dtype=jnp.float32)
    out4 = diagonal_forward(x4, d4, force_pallas=True)
    jax.block_until_ready(out4)
    assert jnp.allclose(out4, x4 * d4, atol=1e-6, rtol=1e-6)

    # Case 5: multiple row blocks with a ragged last block.
    x5 = jax.random.normal(keys[8], (8, 520, 256), dtype=jnp.float32)
    d5 = jax.random.normal(keys[9], (256,), dtype=jnp.float32)
    out5 = diagonal_forward(x5, d5, force_pallas=True)
    jax.block_until_ready(out5)
    assert jnp.allclose(out5, x5 * d5, atol=1e-6, rtol=1e-6)

    # Case 6: bf16 (sublane packing = 16).
    x6 = jax.random.normal(keys[10], (4, 64, 256), dtype=jnp.bfloat16)
    d6 = jax.random.normal(keys[11], (256,), dtype=jnp.bfloat16)
    out6 = diagonal_forward(x6, d6, force_pallas=True)
    jax.block_until_ready(out6)
    assert jnp.allclose(out6.astype(jnp.float32), (x6 * d6).astype(jnp.float32),
                        atol=1e-2, rtol=1e-2)

    # Case 7: wide feature dim NOT a multiple of 128 -> ragged lane boundary.
    x7 = jax.random.normal(keys[12], (2, 64, 2500), dtype=jnp.float32)
    d7 = jax.random.normal(keys[13], (2500,), dtype=jnp.float32)
    out7 = diagonal_forward(x7, d7, force_pallas=True)
    jax.block_until_ready(out7)
    assert jnp.allclose(out7, x7 * d7, atol=1e-6, rtol=1e-6)

    # Case 8: complex path (module's complex=True) -> XLA complex_mul fallback.
    xr = jax.random.normal(keys[14], (2, 8, 32, 2), dtype=jnp.float32)
    dr = jax.random.normal(keys[15], (32, 2), dtype=jnp.float32)
    xc = jax.lax.complex(xr[..., 0], xr[..., 1])
    dc = jax.lax.complex(dr[..., 0], dr[..., 1])
    outc = diagonal_forward(xc, dc)
    jax.block_until_ready(outc)
    assert jnp.allclose(outc, xc * dc, atol=1e-5, rtol=1e-5)

    print("KERNEL_OK")
</pallas_src>

<mosaic_0001>
module attributes {stable_mosaic.version = 11 : i64} {
  func.func @_diag_mul_kernel(%arg0: i32, %arg1: i32, %arg2: memref<1x128xf32, #tpu.memory_space<vmem>>, %arg3: memref<8x128xf32, #tpu.memory_space<vmem>>, %arg4: memref<8x128xf32, #tpu.memory_space<vmem>>) attributes {dimension_semantics = [#tpu.dimension_semantics<parallel>, #tpu.dimension_semantics<parallel>], iteration_bounds = array<i64: 1, 1>, scalar_prefetch = 0 : i64, scratch_operands = 0 : i64, tpu.core_type = #tpu.core_type<tc>, window_params = [{transform_indices = @transform_0, window_bounds = array<i64: 1, 128>}, {transform_indices = @transform_1, window_bounds = array<i64: 8, 128>}, {transform_indices = @transform_2, window_bounds = array<i64: 8, 128>}]} {
    %c0 = arith.constant 0 : index
    %c0_0 = arith.constant 0 : index
    %0 = vector.load %arg3[%c0, %c0_0] : memref<8x128xf32, #tpu.memory_space<vmem>>, vector<8x128xf32>
    %c0_1 = arith.constant 0 : index
    %c0_2 = arith.constant 0 : index
    %1 = vector.load %arg2[%c0_1, %c0_2] : memref<1x128xf32, #tpu.memory_space<vmem>>, vector<1x128xf32>
    %2 = vector.broadcast %1 : vector<1x128xf32> to vector<8x128xf32>
    %3 = arith.mulf %0, %2 : vector<8x128xf32>
    %c0_3 = arith.constant 0 : index
    %c0_4 = arith.constant 0 : index
    %4 = vector.load %arg4[%c0_3, %c0_4] : memref<8x128xf32, #tpu.memory_space<vmem>>, vector<8x128xf32>
    tpu.vector_store %arg4[%c0_3, %c0_4], %3 {strides = array<i32>} : memref<8x128xf32, #tpu.memory_space<vmem>>, vector<8x128xf32>,
    return
  }
  func.func @transform_0(%arg0: i32, %arg1: i32) -> (i32, i32) {
    %c0_i32 = arith.constant 0 : i32
    %c0_i32_0 = arith.constant 0 : i32
    return %c0_i32, %arg0 : i32, i32
  }
  func.func @transform_1(%arg0: i32, %arg1: i32) -> (i32, i32) {
    %c0_i32 = arith.constant 0 : i32
    return %arg1, %arg0 : i32, i32
  }
  func.func @transform_2(%arg0: i32, %arg1: i32) -> (i32, i32) {
    %c0_i32 = arith.constant 0 : i32
    return %arg1, %arg0 : i32, i32
  }
}

</mosaic_0001>

<bundles_post_ra>
// kernel: tpu_custom_call.1
= control target key start
LH: loop header
LB: loop body
LE: loop exit
PB: predicated region body
PF: predicated region fallthrough
CT: control target
= control target key end

     0   :  { %7 = vsyncpa [#allocation3], 0  ;;  %s206_s0 = inlined_call_operand.hbm [shape: f32[1,128], index: 0, kind: input, shape index: {}]   ;;  %s207_s1 = inlined_call_operand.hbm [shape: f32[4,128], index: 1, kind: input, shape index: {}]   ;;  %s208_s2 = inlined_call_operand.hbm [shape: f32[4,128], index: 2, kind: output, shape index: {}]  }
   0x1   :  { %8 = vsyncpa [#allocation6], 0 }
   0x2   :  { %9 = vsyncpa [#allocation4], 0  ;;  %s144_s9 = smov [#allocation2]   ;;  %s72_s13 = scalar_lea.hbm %s206_s0, 16 }
   0x3   :  { %s16_s10 = sshll.u32 %s144_s9, 4  ;;  %p73_p0 = scmp.ne.s32.totalorder %s206_s0, %s72_s13  ;;  %s17_s10 = int_to_ptr.vmem [resolvable:$true] %s16_s10 }
   0x4   :  { %p76_p1 = scmp.lt.u32.totalorder %s72_s13, %s206_s0 }
   0x6   :  { %p78_p2 = pnand %p76_p1, %p73_p0 }
   0x8   :  { %81 = shalt.err (!%p78_p2)
}
   0x9   :  { %s82_s18 = scalar_lea.vmem %s17_s10, 16  ;;  %s86_s19 = scalar_lea.vmem %s17_s10, 32 }
   0xa   :  { %p83_p3 = scmp.ne.s32.totalorder %s17_s10, %s82_s18  ;;  %p87_p4 = scmp.lt.s32.totalorder %s17_s10, %s17_s10 }
   0xb   :  { %p88_p5 = scmp.lt.s32.totalorder %s86_s19, %s82_s18 }
   0xd   :  { %p89_p6 = por %p88_p5, %p87_p4 }
   0xf   :  { %p90_p7 = pnand %p89_p6, %p83_p3 }
  0x11   :  { %93 = shalt.err (!%p90_p7)
}
  0x12   :  { %19 = dma.hbm_to_vmem [thread:$0]  %s206_s0, 16, %s17_s10, [#allocation3]  }
  0x13   :  { %24 = vsyncadd [#allocation6], 64  ;;  %s145_s22 = smov [#allocation5]   ;;  %s94_s26 = scalar_lea.hbm %s207_s1, 64 }
  0x14   :  { %s25_s23 = sshll.u32 %s145_s22, 4  ;;  %p95_p8 = scmp.ne.s32.totalorder %s207_s1, %s94_s26  ;;  %s26_s23 = int_to_ptr.vmem [resolvable:$true] %s25_s23 }
  0x15   :  { %p98_p9 = scmp.lt.u32.totalorder %s94_s26, %s207_s1 }
  0x17   :  { %p100_p10 = pnand %p98_p9, %p95_p8 }
  0x19   :  { %103 = shalt.err (!%p100_p10)
}
  0x1a   :  { %s104_s3 = scalar_lea.vmem %s26_s23, 64  ;;  %s108_s0 = scalar_lea.vmem %s26_s23, 128 }
  0x1b   :  { %p105_p11 = scmp.ne.s32.totalorder %s26_s23, %s104_s3  ;;  %p109_p12 = scmp.lt.s32.totalorder %s26_s23, %s26_s23 }
  0x1c   :  { %p110_p13 = scmp.lt.s32.totalorder %s108_s0, %s104_s3 }
  0x1e   :  { %p111_p0 = por %p110_p13, %p109_p12 }
  0x20   :  { %p112_p1 = pnand %p111_p0, %p105_p11 }
  0x22   :  { %115 = shalt.err (!%p112_p1)
}
  0x23   :  { %s146_s4 = smov 64   ;;  %s147_s5 = smov 4  }
  0x24   :  { %31 = dma.hbm_to_vmem [thread:$0]  %s207_s1, 64, %s26_s23, [#allocation6], %s146_s4, %s146_s4, %s147_s5  }
  0x25   :  { %138 = dma.done.wait [#allocation3], 16  }
  0x26   :  { %139 = vsyncadd [#allocation3], 4294967280 }
  0x27   :  { %140 = dma.done.wait [#allocation6], 128  }
  0x28   :  { %141 = vsyncadd [#allocation6], 4294967168  ;;  %v38_v0 = vld [vmem:[#allocation5] sm:$0xff]  ;;  %v66_v1 = vld [vmem:[#allocation2] ss:$0 sm:$0xff] }
  0x29   :  { %v46_v2 = vmul.f32 %v66_v1, %v38_v0 }
  0x2b   :  { %47 = vst [vmem:[#allocation7] sm:$0xff] %v46_v2 }
  0x2c   :  { %52 = vsyncadd [#allocation4], 64  ;;  %s148_s8 = smov [#allocation7]  }
  0x2d   :  { %s53_s9 = sshll.u32 %s148_s8, 4  ;;  %s54_s9 = int_to_ptr.vmem [resolvable:$true] %s53_s9 }
  0x2e   :  { %s116_s10 = scalar_lea.vmem %s54_s9, 64  ;;  %s120_s11 = scalar_lea.vmem %s54_s9, 128 }
  0x2f   :  { %p117_p2 = scmp.ne.s32.totalorder %s54_s9, %s116_s10  ;;  %p121_p3 = scmp.lt.s32.totalorder %s54_s9, %s54_s9 }
  0x30   :  { %p122_p4 = scmp.lt.s32.totalorder %s120_s11, %s116_s10 }
  0x32   :  { %p123_p5 = por %p122_p4, %p121_p3 }
  0x34   :  { %p124_p6 = pnand %p123_p5, %p117_p2 }
  0x36   :  { %127 = shalt.err (!%p124_p6)
}
  0x37   :  { %s128_s13 = scalar_lea.hbm %s208_s2, 64 }
  0x38   :  { %p129_p7 = scmp.ne.s32.totalorder %s208_s2, %s128_s13  ;;  %p132_p8 = scmp.lt.u32.totalorder %s128_s13, %s208_s2 }
  0x3a   :  { %p134_p9 = pnand %p132_p8, %p129_p7 }
  0x3c   :  { %137 = shalt.err (!%p134_p9)
}
  0x3d   :  { %59 = dma.vmem_to_hbm [thread:$0]  %s54_s9, 64, %s208_s2, [#allocation4], %s146_s4, %s146_s4, %s147_s5  }
  0x3e   :  { %142 = dma.done.wait [#allocation4], 128  }
  0x3f   :  { %143 = vsyncadd [#allocation4], 4294967168 }
  0x40   :  { %63 = vsyncpa [#allocation3], 1 }
  0x41   :  { %64 = vsyncpa [#allocation6], 1 }
  0x42   :  { %65 = vsyncpa [#allocation4], 1 }

</bundles_post_ra>
